<compile_context>
chip_gen: v5e
topology: v5e:2x2
jax: 0.10.0
libtpu: 0.0.40
codegen_flags: <defaults>
</compile_context>

<pallas_src>
import functools

import jax
import jax.numpy as jnp
from jax.experimental import pallas as pl
from jax.experimental.pallas import tpu as pltpu

NUM_FEATURES = 9
HIDDEN_DIM = 64
HIDDEN2 = HIDDEN_DIM // 2
LANES = 128

# ---- packed-slab layout (static offsets, 8-sublane aligned) ----
W1_ROW = 0                        # slab[0, :64]    = W1^T   (Linear(1, 64))
B1_ROW = 1                        # slab[1, :64]    = b1
B2_ROW = 2                        # slab[2, :32]    = b2
B3_ROW = 3                        # slab[3, :9]     = b3
W2_ROW0 = 8                       # slab[8:72,  :32] = W2^T  (64 x 32, rest zero)
W3_ROW0 = W2_ROW0 + HIDDEN_DIM    # slab[72:104, :9] = W3^T  (32 x 9,  rest zero)
SLAB_ROWS = W3_ROW0 + HIDDEN2     # 104 rows x 128 lanes x 4 B = 52 KB


def _ensemble_weight_kernel(x_ref, slab_ref, o_ref):
    x = x_ref[...]                                      # (TB, 1) scalar inputs

    w1 = slab_ref[W1_ROW:W1_ROW + 1, :]                 # (1, 128); lanes >= 64 are 0
    b1 = slab_ref[B1_ROW:B1_ROW + 1, :]
    b2 = slab_ref[B2_ROW:B2_ROW + 1, :]
    b3 = slab_ref[B3_ROW:B3_ROW + 1, :]

    # Layer 1: Linear(1 -> 64) + ReLU on the VPU (no MXU for a K=1 matmul).
    # Dropout(0.3) is identity at inference.
    h1 = jnp.maximum(x * w1 + b1, 0.0)                  # (TB, 128); lanes >= 64 stay 0

    # Layer 2: Linear(64 -> 32) + ReLU; K=64 MXU contraction, lane-dense N=128.
    # Dropout(0.2) is identity at inference.
    w2 = slab_ref[W2_ROW0:W2_ROW0 + HIDDEN_DIM, :]      # (64, 128), zero-padded cols
    h2 = jnp.maximum(
        jnp.dot(h1[:, :HIDDEN_DIM], w2, preferred_element_type=jnp.float32) + b2,
        0.0)                                            # (TB, 128); lanes >= 32 stay 0

    # Layer 3: Linear(32 -> 9) + Tanh; K=32 MXU contraction.
    w3 = slab_ref[W3_ROW0:W3_ROW0 + HIDDEN2, :]         # (32, 128), zero-padded cols
    y = jnp.tanh(
        jnp.dot(h2[:, :HIDDEN2], w3, preferred_element_type=jnp.float32) + b3)

    # Padded lanes of y are tanh(0) = 0, so the 128-lane abs-sum equals the
    # 9-feature abs-sum.  Exact reciprocal preserves the 1e-4 L1 invariant
    # (approx rcp error ~2^-12 would be at the invariant's scale).
    denom = jnp.sum(jnp.abs(y), axis=1, keepdims=True) + 1e-8
    o_ref[...] = y * pl.reciprocal(denom, approx=False)  # unmasked (TB, 128) store


def pack_params(w1, b1, w2, b2, w3, b3,
                num_features=NUM_FEATURES, hidden_dim=HIDDEN_DIM):
    """Pack PyTorch-layout nn.Linear params into one lane-aligned f32 slab.

    Expected (PyTorch) layouts:
      w1: (hidden, 1),               b1: (hidden,)
      w2: (hidden//2, hidden),       b2: (hidden//2,)
      w3: (num_features, hidden//2), b3: (num_features,)
    Weights are transposed here to (in, out) and zero-padded; callers must NOT
    pre-transpose them.

    NOTE: all padding lanes/rows MUST remain exactly zero -- the kernel relies
    on zero padding so the 128-lane |y| abs-sum equals the 9-feature abs-sum
    (load-bearing for the L1 normalization).
    """
    h2 = hidden_dim // 2
    w1 = jnp.asarray(w1, jnp.float32).reshape(hidden_dim)      # (hidden,1) -> row
    b1 = jnp.asarray(b1, jnp.float32).reshape(hidden_dim)
    w2 = jnp.asarray(w2, jnp.float32).reshape(h2, hidden_dim)
    b2 = jnp.asarray(b2, jnp.float32).reshape(h2)
    w3 = jnp.asarray(w3, jnp.float32).reshape(num_features, h2)
    b3 = jnp.asarray(b3, jnp.float32).reshape(num_features)

    slab = jnp.zeros((SLAB_ROWS, LANES), jnp.float32)
    slab = slab.at[W1_ROW, :hidden_dim].set(w1)
    slab = slab.at[B1_ROW, :hidden_dim].set(b1)
    slab = slab.at[B2_ROW, :h2].set(b2)
    slab = slab.at[B3_ROW, :num_features].set(b3)
    slab = slab.at[W2_ROW0:W2_ROW0 + hidden_dim, :h2].set(w2.T)
    slab = slab.at[W3_ROW0:W3_ROW0 + h2, :num_features].set(w3.T)
    return slab


def _round_up(n, m):
    return ((n + m - 1) // m) * m


@functools.partial(jax.jit, static_argnames=("block_b", "padded_b"))
def _forward_padded(slab, xs, *, block_b, padded_b):
    """xs: (B,) f32 scalars -> (B, NUM_FEATURES) normalized weights."""
    b = xs.shape[0]
    x_pad = jnp.zeros((padded_b, 1), jnp.float32).at[:b, 0].set(xs)
    out = pl.pallas_call(
        _ensemble_weight_kernel,
        out_shape=jax.ShapeDtypeStruct((padded_b, LANES), jnp.float32),
        grid=(padded_b // block_b,),
        in_specs=[
            pl.BlockSpec((block_b, 1), lambda i: (i, 0)),          # scalar inputs
            pl.BlockSpec((SLAB_ROWS, LANES), lambda i: (0, 0)),    # weight slab (resident)
        ],
        out_specs=pl.BlockSpec((block_b, LANES), lambda i: (i, 0)),
        compiler_params=pltpu.CompilerParams(
            dimension_semantics=("parallel",)),                    # v7x: shard batch over 2 TCs
    )(x_pad, slab)
    return out[:b, :NUM_FEATURES]   # slice folded into the same jitted executable


def ensemble_weight_forward_batch(slab, xs):
    """Batched forward: xs is (B,) scalar dummy inputs -> (B, NUM_FEATURES)."""
    xs = jnp.asarray(xs, jnp.float32).reshape(-1)
    b = xs.shape[0]
    b8 = _round_up(b, 8)                       # f32 sublane multiple
    if b8 >= 128:
        block_b = 128                          # native MXU M-tile
        padded_b = _round_up(b, 128)
    else:
        block_b = b8
        padded_b = b8
    return _forward_padded(slab, xs, block_b=block_b, padded_b=padded_b)


class EnsembleWeightNet:
    """JAX/Pallas port of the PyTorch EnsembleWeightNet (eval-mode forward)."""

    def __init__(self, params, num_features=NUM_FEATURES, hidden_dim=HIDDEN_DIM):
        self.num_features = num_features
        self.slab = pack_params(*params, num_features=num_features,
                                hidden_dim=hidden_dim)
        self._default_out = None   # cached result for the constant ones(1,1) input

    def __call__(self, dummy_input=None):
        if dummy_input is None:
            # Output is a pure function of the static weights for the default
            # constant input: compute once, reuse thereafter (no kernel launch).
            if self._default_out is None:
                self._default_out = ensemble_weight_forward_batch(
                    self.slab, jnp.ones((1,), jnp.float32))[0]
            return self._default_out
        x = jnp.asarray(dummy_input, jnp.float32)
        if x.size != 1:
            # PyTorch's forward only ever feeds a single scalar through
            # Linear(1, hidden); anything else is an error, not a silent trim.
            raise ValueError(
                f"dummy_input must contain exactly one element, got shape {x.shape}")
        return ensemble_weight_forward_batch(self.slab, x.reshape(1))[0]

    def forward_batch(self, xs):
        """Extension: many independent forward passes in one MXU-friendly call."""
        return ensemble_weight_forward_batch(self.slab, xs)


def init_params(key, num_features=NUM_FEATURES, hidden_dim=HIDDEN_DIM):
    """Xavier-uniform weights (gain=1), zero biases, in PyTorch (out, in) layout."""
    k1, k2, k3 = jax.random.split(key, 3)

    def xavier(k, fan_out, fan_in):
        bound = jnp.sqrt(6.0 / (fan_in + fan_out))
        return jax.random.uniform(k, (fan_out, fan_in), jnp.float32, -bound, bound)

    h2 = hidden_dim // 2
    w1 = xavier(k1, hidden_dim, 1)
    b1 = jnp.zeros((hidden_dim,), jnp.float32)
    w2 = xavier(k2, h2, hidden_dim)
    b2 = jnp.zeros((h2,), jnp.float32)
    w3 = xavier(k3, num_features, h2)
    b3 = jnp.zeros((num_features,), jnp.float32)
    return (w1, b1, w2, b2, w3, b3)


def _reference_forward(params, x):
    """Pure-JAX reference (PyTorch-layout weights, eval-mode dropout). x: (B, 1)."""
    w1, b1, w2, b2, w3, b3 = params
    h1 = jnp.maximum(x @ w1.T + b1, 0.0)
    h2 = jnp.maximum(h1 @ w2.T + b2, 0.0)
    y = jnp.tanh(h2 @ w3.T + b3)
    return y / (jnp.sum(jnp.abs(y), axis=1, keepdims=True) + 1e-8)


if __name__ == "__main__":
    key = jax.random.PRNGKey(0)
    pkey, xkey, bkey = jax.random.split(key, 3)

    params = init_params(pkey)
    net = EnsembleWeightNet(params)            # packs the 104x128 slab once

    # Default (constant ones(1,1)) path: one kernel launch, then served from cache.
    w_default = jax.block_until_ready(net())
    w_default_again = net()                    # cached, no relaunch

    # Explicit single scalar dummy input (1-D path, mirrors PyTorch unsqueeze).
    dummy = jax.random.normal(xkey, (1,), dtype=jnp.float32)
    w_custom = jax.block_until_ready(net(dummy))

    # Batched forwards (5 scalars) through the parallel-grid MXU path.
    xs = jax.random.normal(bkey, (5,), dtype=jnp.float32)
    w_batch = jax.block_until_ready(net.forward_batch(xs))

    # Correctness against a pure-JAX reference of the PyTorch module.
    ref_default = _reference_forward(params, jnp.ones((1, 1), jnp.float32))[0]
    ref_custom = _reference_forward(params, dummy.reshape(1, 1))[0]
    ref_batch = _reference_forward(params, xs.reshape(-1, 1))

    assert w_default.shape == (NUM_FEATURES,)
    assert w_custom.shape == (NUM_FEATURES,)
    assert w_batch.shape == (5, NUM_FEATURES)
    assert jnp.allclose(w_default, ref_default, atol=2e-5)
    assert jnp.allclose(w_default_again, w_default)
    assert jnp.allclose(w_custom, ref_custom, atol=2e-5)
    assert jnp.allclose(w_batch, ref_batch, atol=2e-5)
    assert jnp.allclose(jnp.sum(jnp.abs(w_default)), 1.0, atol=1e-4)
    assert jnp.allclose(jnp.sum(jnp.abs(w_custom)), 1.0, atol=1e-4)

    print("KERNEL_OK")
</pallas_src>

<mosaic_0001>
module attributes {stable_mosaic.version = 11 : i64} {
  func.func @_ensemble_weight_kernel(%arg0: i32, %arg1: memref<8x1xf32, #tpu.memory_space<vmem>>, %arg2: memref<104x128xf32, #tpu.memory_space<vmem>>, %arg3: memref<8x128xf32, #tpu.memory_space<vmem>>) attributes {dimension_semantics = [#tpu.dimension_semantics<parallel>], iteration_bounds = array<i64: 1>, scalar_prefetch = 0 : i64, scratch_operands = 0 : i64, tpu.core_type = #tpu.core_type<tc>, window_params = [{transform_indices = @transform_0, window_bounds = array<i64: 8, 1>}, {pipeline_mode = #tpu.pipeline_mode<synchronous>, transform_indices = @transform_1, window_bounds = array<i64: 104, 128>}, {transform_indices = @transform_2, window_bounds = array<i64: 8, 128>}]} {
    %c0 = arith.constant 0 : index
    %c0_0 = arith.constant 0 : index
    %0 = vector.load %arg1[%c0, %c0_0] : memref<8x1xf32, #tpu.memory_space<vmem>>, vector<8x1xf32>
    %c0_1 = arith.constant 0 : index
    %c0_2 = arith.constant 0 : index
    %1 = vector.load %arg2[%c0_1, %c0_2] : memref<104x128xf32, #tpu.memory_space<vmem>>, vector<1x128xf32>
    %c1 = arith.constant 1 : index
    %c0_3 = arith.constant 0 : index
    %2 = vector.load %arg2[%c1, %c0_3] : memref<104x128xf32, #tpu.memory_space<vmem>>, vector<1x128xf32>
    %c2 = arith.constant 2 : index
    %c0_4 = arith.constant 0 : index
    %3 = vector.load %arg2[%c2, %c0_4] : memref<104x128xf32, #tpu.memory_space<vmem>>, vector<1x128xf32>
    %c3 = arith.constant 3 : index
    %c0_5 = arith.constant 0 : index
    %4 = vector.load %arg2[%c3, %c0_5] : memref<104x128xf32, #tpu.memory_space<vmem>>, vector<1x128xf32>
    %5 = vector.broadcast %0 : vector<8x1xf32> to vector<8x128xf32>
    %6 = vector.broadcast %1 : vector<1x128xf32> to vector<8x128xf32>
    %7 = arith.mulf %5, %6 : vector<8x128xf32>
    %8 = vector.broadcast %2 : vector<1x128xf32> to vector<8x128xf32>
    %9 = arith.addf %7, %8 : vector<8x128xf32>
    %cst = arith.constant 0.000000e+00 : f32
    %10 = vector.broadcast %cst : f32 to vector<8x128xf32>
    %11 = arith.maximumf %9, %10 : vector<8x128xf32>
    %c8 = arith.constant 8 : index
    %c0_6 = arith.constant 0 : index
    %12 = vector.load %arg2[%c8, %c0_6] : memref<104x128xf32, #tpu.memory_space<vmem>>, vector<64x128xf32>
    %13 = vector.extract_strided_slice %11 {offsets = [0, 0], sizes = [8, 64], strides = [1, 1]} : vector<8x128xf32> to vector<8x64xf32>
    %cst_7 = arith.constant dense<0.000000e+00> : vector<8x128xf32>
    %14 = tpu.matmul %13, %12, %cst_7 {dimension_numbers = #tpu.dot_dimension_numbers<[1], [0], [0], [1], [0, 0, 1, 1], [], []>} : vector<8x64xf32>, vector<64x128xf32>, vector<8x128xf32> -> vector<8x128xf32>
    %15 = vector.broadcast %3 : vector<1x128xf32> to vector<8x128xf32>
    %16 = arith.addf %14, %15 : vector<8x128xf32>
    %cst_8 = arith.constant 0.000000e+00 : f32
    %17 = vector.broadcast %cst_8 : f32 to vector<8x128xf32>
    %18 = arith.maximumf %16, %17 : vector<8x128xf32>
    %c72 = arith.constant 72 : index
    %c0_9 = arith.constant 0 : index
    %19 = vector.load %arg2[%c72, %c0_9] : memref<104x128xf32, #tpu.memory_space<vmem>>, vector<32x128xf32>
    %20 = vector.extract_strided_slice %18 {offsets = [0, 0], sizes = [8, 32], strides = [1, 1]} : vector<8x128xf32> to vector<8x32xf32>
    %cst_10 = arith.constant dense<0.000000e+00> : vector<8x128xf32>
    %21 = tpu.matmul %20, %19, %cst_10 {dimension_numbers = #tpu.dot_dimension_numbers<[1], [0], [0], [1], [0, 0, 1, 1], [], []>} : vector<8x32xf32>, vector<32x128xf32>, vector<8x128xf32> -> vector<8x128xf32>
    %22 = vector.broadcast %4 : vector<1x128xf32> to vector<8x128xf32>
    %23 = arith.addf %21, %22 : vector<8x128xf32>
    %24 = math.tanh %23 : vector<8x128xf32>
    %25 = math.absf %24 : vector<8x128xf32>
    %cst_11 = arith.constant dense<0.000000e+00> : vector<8xf32>
    %26 = vector.multi_reduction <add>, %25, %cst_11 [1] : vector<8x128xf32> to vector<8xf32>
    %27 = vector.shape_cast %26 : vector<8xf32> to vector<8x1xf32>
    %cst_12 = arith.constant 9.99999993E-9 : f32
    %28 = vector.broadcast %cst_12 : f32 to vector<8x1xf32>
    %29 = arith.addf %27, %28 : vector<8x1xf32>
    %30 = tpu.reciprocal %29 : vector<8x1xf32> -> vector<8x1xf32>
    %31 = vector.broadcast %30 : vector<8x1xf32> to vector<8x128xf32>
    %32 = arith.mulf %24, %31 : vector<8x128xf32>
    %c0_13 = arith.constant 0 : index
    %c0_14 = arith.constant 0 : index
    %33 = vector.load %arg3[%c0_13, %c0_14] : memref<8x128xf32, #tpu.memory_space<vmem>>, vector<8x128xf32>
    tpu.vector_store %arg3[%c0_13, %c0_14], %32 {strides = array<i32>} : memref<8x128xf32, #tpu.memory_space<vmem>>, vector<8x128xf32>,
    return
  }
  func.func @transform_0(%arg0: i32) -> (i32, i32) {
    %c0_i32 = arith.constant 0 : i32
    %c0_i32_0 = arith.constant 0 : i32
    return %arg0, %c0_i32 : i32, i32
  }
  func.func @transform_1(%arg0: i32) -> (i32, i32) {
    %c0_i32 = arith.constant 0 : i32
    %c0_i32_0 = arith.constant 0 : i32
    %c0_i32_1 = arith.constant 0 : i32
    return %c0_i32, %c0_i32_0 : i32, i32
  }
  func.func @transform_2(%arg0: i32) -> (i32, i32) {
    %c0_i32 = arith.constant 0 : i32
    %c0_i32_0 = arith.constant 0 : i32
    return %arg0, %c0_i32 : i32, i32
  }
}

</mosaic_0001>

<bundles_post_ra>
// kernel: _forward_padded.1
= control target key start
LH: loop header
LB: loop body
LE: loop exit
PB: predicated region body
PF: predicated region fallthrough
CT: control target
= control target key end

     0   :  { %7 = vsyncpa [#allocation3], 0  ;;  %s172_s12 = smov [#allocation2]   ;;  %s173_s14 = smov 128   ;;  %s200_s0 = inlined_call_operand.vmem [shape: f32[8,1], index: 0, kind: input, shape index: {}]   ;;  %s201_s1 = inlined_call_operand.hbm [shape: f32[104,128], index: 1, kind: input, shape index: {}]   ;;  %s202_s2 = inlined_call_operand.vmem [shape: f32[8,128], index: 2, kind: output, shape index: {}]  }
   0x1   :  { %s14_s11 = sshll.u32 %s201_s1, 4  ;;  %s16_s13 = sshll.u32 %s172_s12, 4  ;;  %s15_s11 = int_to_ptr.hbm [resolvable:$true] %s14_s11  ;;  %s17_s13 = int_to_ptr.vmem [resolvable:$true] %s16_s13 }
   0x2   :  { %s174_s15 = smov 8  }
   0x3   :  { %22 = dma.hbm_to_vmem [thread:$0]  %s15_s11, 1664, %s17_s13, [#allocation3], %s173_s14, %s173_s14, %s174_s15  }
   0x4   :  { %170 = dma.done.wait [#allocation3], 1664  }
   0x5   :  { %171 = vsyncadd [#allocation3], 4294965632  ;;  %v175_v0 = vmov 0   ;;  %v27_v1 = vld [vmem:[%s200_s0] sm:$0xff]  ;;  %v48_v3 = vld [vmem:[#allocation2 + $0x38] sm:$0xff]  ;;  %vm51_vm0 = vcmask 523264  }
   0x6   :  { %137 = vset.pattern.permute.xlu0 %v175_v0  ;;  %v49_v2 = vld [vmem:[#allocation2 + $0x40] sm:$0xff]  ;;  %v47_v4 = vld [vmem:[#allocation2 + $0x30] sm:$0xff]  ;;  %v46_v5 = vld [vmem:[#allocation2 + $0x28] sm:$0xff]  ;;  %vm81_vm1 = vcmask 261120  }
   0x7   :  { %34 = vperm.xlu0 %137, %v27_v1   ;;  %63 = vmatpush.msra.mxu0 %v49_v2  ;;  %v45_v6 = vld [vmem:[#allocation2 + $0x20] sm:$0xff]  ;;  %v44_v7 = vld [vmem:[#allocation2 + $0x18] sm:$0xff]  ;;  %v43_v8 = vld [vmem:[#allocation2 + $0x10] sm:$0xff] }
   0x8   :  { %v42_v9 = vld [vmem:[#allocation2 + $0x8] sm:$0xff]  ;;  %v79_v10 = vld [vmem:[#allocation2 + $0x60] sm:$0xff]  ;;  %v78_v17 = vld [vmem:[#allocation2 + $0x58] sm:$0xff] }
   0x9   :  { %64 = vmatpush.msra.mxu0 %v48_v3  ;;  %97 = vmatpush.msra.mxu1 %v79_v10  ;;  %v138_v11 = vld [vmem:[#allocation2] ss:$0 sm:$0xff]  ;;  %v139_v12 = vld [vmem:[#allocation2 + $0x1] ss:$0 sm:$0xff]  ;;  %v77_v18 = vld [vmem:[#allocation2 + $0x50] sm:$0xff] }
   0xa   :  { %v76_v19 = vld [vmem:[#allocation2 + $0x48] sm:$0xff]  ;;  %v140_v20 = vld [vmem:[#allocation2 + $0x2] ss:$0 sm:$0xff]  ;;  %v141_v24 = vld [vmem:[#allocation2 + $0x3] ss:$0 sm:$0xff] }
   0xb   :  { %65 = vmatpush.msra.mxu0 %v47_v4  ;;  %98 = vmatpush.msra.mxu1 %v78_v17 }
   0xd   :  { %66 = vmatpush.msra.mxu0 %v46_v5  ;;  %99 = vmatpush.msra.mxu1 %v77_v18 }
   0xf   :  { %67 = vmatpush.msra.mxu0 %v45_v6  ;;  %100 = vmatpush.msra.mxu1 %v76_v19 }
  0x11   :  { %68 = vmatpush.msra.mxu0 %v44_v7 }
  0x13   :  { %69 = vmatpush.msra.mxu0 %v43_v8 }
  0x15   :  { %70 = vmatpush.msra.mxu0 %v42_v9 }
  0x79   :  { %v35_v13 = vpop.permute.xlu0 %34 }
  0x7a   :  { %v38_v14 = vmul.f32 %v138_v11, %v35_v13 }
  0x7c   :  { %v40_v15 = vadd.f32 %v139_v12, %v38_v14 }
  0x7e   :  { %v41_v16 = vmax.f32 %v40_v15, 0.0 }
  0x80   :  { %131 = vmatmul.msk.f32.vlgmr.msra.gmra.mxu0 %vm51_vm0, %v41_v16 }
  0xfd   :  { %v72_v21 = vpop.f32.mrf.mxu0 }
  0xfe   :  { %v73_v22 = vadd.f32 %v140_v20, %v72_v21 }
 0x100   :  { %v75_v23 = vmax.f32 %v73_v22, 0.0 }
 0x102   :  { %132 = vmatmul.msk.f32.vlgmr.msra.gmra.mxu1 %vm81_vm1, %v75_v23 }
 0x17f   :  { %v102_v25 = vpop.f32.mrf.mxu1 }
 0x180   :  { %v103_v26 = vadd.f32 %v141_v24, %v102_v25 }
 0x182   :  { %142 = vtanh.f32 %v103_v26 }
 0x188   :  { %v143_v27 = vpop.eup %142 }
 0x189   :  { %v106_v28 = vand.u32 2147483647, %v143_v27 }
 0x18b   :  { %107 = vadd.xlane.f32.xlu0 %v106_v28 }
 0x1fe   :  { %v108_v29 = vpop.xlane.xlu0 %107 }
 0x1ff   :  { %v109_v30 = vadd.f32 1e-08, %v108_v29 }
 0x201   :  { %144 = vrcp.f32 %v109_v30  ;;  %v121_v34 = vand.u32 2147483648, %v109_v30  ;;  %v119_v36 = vand.u32 2147483647, %v109_v30  ;;  %vm115_vm3 = vweird.f32 %v109_v30 }
 0x203   :  { %v122_v38 = vor.u32 1.1754944e-38, %v121_v34  ;;  %vm120_vm5 = vcmp.eq.f32.partialorder %v119_v36, 8.507059e+37 }
 0x207   :  { %v145_v31 = vpop.eup %144 }
 0x208   :  { %v111_v32 = vmul.f32 %v145_v31, %v109_v30  ;;  %vm116_vm2 = vweird.f32 %v145_v31 }
 0x209   :  { %vm117_vm4 = vmor %vm115_vm3, %vm116_vm2 }
 0x20a   :  { %v112_v33 = vsub.f32 1.0, %v111_v32 }
 0x20c   :  { %v113_v35 = vmul.f32 %v145_v31, %v112_v33 }
 0x20e   :  { %v114_v37 = vadd.f32 %v145_v31, %v113_v35 }
 0x210   :  { %v118_v39 = vsel %vm117_vm4, %v145_v31, %v114_v37 }
 0x211   :  { %v123_v40 = vsel %vm120_vm5, %v122_v38, %v118_v39 }
 0x212   :  { %v124_v41 = vmul.f32 %v143_v27, %v123_v40 }
 0x214   :  { %125 = vst [vmem:[%s202_s2] sm:$0xff] %v124_v41 }
 0x215   :  { %130 = vsyncpa [#allocation3], 1 }

</bundles_post_ra>
